<compile_context>
chip_gen: v7x
topology: tpu7x:2x2x1
jax: 0.10.0
libtpu: 0.0.40
codegen_flags: <defaults>
</compile_context>

<pallas_src>
import jax
import jax.numpy as jnp
from jax import lax
from jax.experimental import pallas as pl
from jax.experimental.pallas import tpu as pltpu


def _round_up(x, m):
    return ((x + m - 1) // m) * m


# ---------------------------------------------------------------------------------------------
# Kernel
# ---------------------------------------------------------------------------------------------
def _make_kernel(dims, T, greedy):
    E, H, C, LAST, Vp = dims['E'], dims['H'], dims['C'], dims['LAST'], dims['Vp']
    KL = E + C + H                     # fused matmul contraction length
    DL = 2 * LAST
    f32, bf16 = jnp.float32, jnp.bfloat16

    def kernel(tok_ref, hc_ref, encactx_ref, emb_ref, w_ref, b_ref,
               logp_ref, hcout_ref, attnw_ref, toks_ref, amax_ref):
        # ---- loop-invariant weight/bias views: read ONCE, stay in vregs for all T steps ----
        w_lstm = w_ref[0:KL, 0:4 * H]                       # (KL, 4H)   bf16
        w_dec = w_ref[KL:2 * KL, 0:DL]                      # (KL, 2*LAST) bf16, cols [even|odd]
        ahw = w_ref[2 * KL:2 * KL + H, 0:H]                 # (H, H)     bf16
        out_w = w_ref[2 * KL + H:2 * KL + H + LAST, 0:Vp]   # (LAST, Vp) bf16
        attn_bias = b_ref[0:1, 0:H]                         # (1, H)  f32
        apw_bf = b_ref[0:1, H:2 * H].astype(bf16)           # (1, H)  bf16 (MXU operand)
        dec_b = b_ref[0:1, 2 * H:2 * H + DL]                # (1, 2*LAST) f32
        lstm_b = b_ref[1:2, 0:4 * H]                        # (1, 4H) f32
        out_b = b_ref[2:3, 0:Vp]                            # (1, Vp) f32 (-1e30 on pad lanes)
        enc_bf = encactx_ref[:, 0:C].astype(bf16)           # (L, C)  bf16
        actx = encactx_ref[:, C:C + H]                      # (L, H)  f32

        # carried LSTM state (h row 0, c row 1) lives directly in the output ref
        hcout_ref[...] = hc_ref[...]

        def step(t, carry):
            # --- token for this step (SMEM scalar): greedy feedback or teacher forcing ---
            if greedy:
                prev = toks_ref[jnp.maximum(t - 1, 0)]       # own argmax from step t-1
                tok = jnp.where(t == 0, tok_ref[0], prev)
            else:
                tok = tok_ref[t]
            # --- embedding: direct dynamic row load (Dropout is identity in eval mode) ---
            x_emb = emb_ref[pl.ds(tok, 1), :]                # (1, E) f32

            h = hcout_ref[0:1, :]                            # (1, H) f32
            c = hcout_ref[1:2, :]                            # (1, H) f32

            # --- attention (lane-dense): softmax_L( tanh(hW + actx + b) . attn_p_w ) ---
            ah = jnp.dot(h.astype(bf16), ahw, preferred_element_type=f32)      # (1, H)
            pre = jnp.tanh(ah + actx + attn_bias)                              # (L, H)
            # attn_post's scalar bias is constant over L -> cancels in softmax; omitted.
            scores = jnp.einsum('ah,lh->al', apw_bf, pre.astype(bf16),
                                preferred_element_type=f32)                    # (1, L)
            m = jnp.max(scores, axis=-1, keepdims=True)
            e = jnp.exp(scores - m)
            attn = e / jnp.sum(e, axis=-1, keepdims=True)                      # (1, L)
            attnw_ref[pl.ds(t, 1), :] = attn
            context = jnp.dot(attn.astype(bf16), enc_bf,
                              preferred_element_type=f32)                      # (1, C)

            # --- LSTM step: ONE fused (1,KL)@(KL,4H) matmul on [emb | ctx | h] ---
            xcat_base = jnp.concatenate([x_emb, context], axis=-1)             # (1, E+C)
            xcat = jnp.concatenate([xcat_base, h], axis=-1).astype(bf16)       # (1, KL)
            gates = jnp.dot(xcat, w_lstm, preferred_element_type=f32) + lstm_b  # (1, 4H)
            sg = jax.nn.sigmoid(gates)                                          # one EUP sweep
            tg = jnp.tanh(gates)                                                # one EUP sweep
            c_new = sg[:, H:2 * H] * c + sg[:, 0:H] * tg[:, 2 * H:3 * H]
            h_new = sg[:, 3 * H:4 * H] * jnp.tanh(c_new)
            hcout_ref[0:1, :] = h_new
            hcout_ref[1:2, :] = c_new

            # --- DecoderDoubleOut + MaxPool1d(2,2): ONE fused matmul, cols packed [even|odd]
            xcat2 = jnp.concatenate([xcat_base, h_new], axis=-1).astype(bf16)  # (1, KL)
            d = jnp.dot(xcat2, w_dec, preferred_element_type=f32) + dec_b      # (1, 2*LAST)
            pooled = jnp.maximum(d[:, 0:LAST], d[:, LAST:DL]).astype(bf16)     # (1, LAST)

            # --- final Linear (vocab padded lane-dense to Vp) + LogSoftmax ---
            logits = jnp.dot(pooled, out_w, preferred_element_type=f32) + out_b  # (1, Vp)
            lm = jnp.max(logits, axis=-1, keepdims=True)
            z = logits - lm
            logp = z - jnp.log(jnp.sum(jnp.exp(z), axis=-1, keepdims=True))
            logp_ref[pl.ds(t, 1), :] = logp

            # --- greedy prediction: argmax over lanes (pad lanes hold -1e30, never win) ---
            lane_ids = lax.broadcasted_iota(jnp.int32, logits.shape, 1)
            amax_ref[...] = jnp.min(jnp.where(logits >= lm, lane_ids, Vp),
                                    axis=-1, keepdims=True)
            toks_ref[t] = amax_ref[0, 0]                      # vector -> scalar -> SMEM
            return carry

        if T == 1:
            step(0, 0)
        else:
            lax.fori_loop(0, T, step, 0, unroll=(T <= 8))

    return kernel


def _build_call(dims, T, L, greedy):
    Vp, H = dims['Vp'], dims['H']
    smem = pl.BlockSpec(memory_space=pltpu.MemorySpace.SMEM)
    vmem = pl.BlockSpec(memory_space=pltpu.MemorySpace.VMEM)
    return pl.pallas_call(
        _make_kernel(dims, T, greedy),
        out_shape=(
            jax.ShapeDtypeStruct((T, Vp), jnp.float32),      # per-step log-probs (lane dense)
            jax.ShapeDtypeStruct((2, H), jnp.float32),       # final [h; c]
            jax.ShapeDtypeStruct((T, L), jnp.float32),       # per-step attention weights
            jax.ShapeDtypeStruct((T,), jnp.int32),           # per-step greedy token
        ),
        in_specs=[smem, vmem, vmem, vmem, vmem, vmem],
        out_specs=(vmem, vmem, vmem, smem),
        scratch_shapes=[pltpu.VMEM((1, 1), jnp.int32)],      # argmax vector->scalar bounce
    )


# ---------------------------------------------------------------------------------------------
# One-time weight packing + jitted wrappers
# ---------------------------------------------------------------------------------------------
def prepare_params(params):
    """One-time packing of all weights into two slabs (hoisted out of the per-step path)."""
    f32, bf16 = jnp.float32, jnp.bfloat16
    V, E = params['emb_w'].shape
    H = params['attn_h_w'].shape[0]
    C = params['attn_c_w'].shape[1]
    DL = params['o_bias'].shape[0]
    LAST = DL // 2
    Vp = _round_up(V, 128)
    KL = E + C + H

    # LSTM fused weight, rows [embedding; context; hidden] to match the in-kernel concat.
    w_lstm = jnp.concatenate([params['w_ih'].T, params['w_hh'].T], axis=0)            # (KL, 4H)
    # DecoderDoubleOut fused weight, same row order so [emb|ctx] is reused; output columns
    # packed [even | odd] so MaxPool1d(2,2) == max(d[:, :LAST], d[:, LAST:]).
    w_dec_full = jnp.concatenate(
        [params['eo_w'].T, params['co_w'].T, params['ho_w'].T], axis=0)                # (KL, DL)
    w_dec = jnp.concatenate([w_dec_full[:, 0::2], w_dec_full[:, 1::2]], axis=1)
    ahw = params['attn_h_w'].T                                                         # (H, H)
    out_w = jnp.zeros((LAST, Vp), f32).at[:, :V].set(params['out_w'].T)                # (LAST, Vp)

    # Single bf16 weight slab (one HBM->VMEM DMA): rows [w_lstm; w_dec; ahw; out_w].
    WL = max(4 * H, Vp, 2 * H + DL, H)

    def pad_lanes(w):
        return jnp.pad(w, ((0, 0), (0, WL - w.shape[1])))

    w_slab = jnp.concatenate(
        [pad_lanes(w_lstm), pad_lanes(w_dec), pad_lanes(ahw), pad_lanes(out_w)], axis=0)
    rows = w_slab.shape[0]
    w_slab = jnp.pad(w_slab, ((0, _round_up(rows, 8) - rows), (0, 0))).astype(bf16)

    # Single f32 bias slab: row0=[attn_bias | attn_p_w | dec_bias(even|odd)], row1=lstm bias,
    # row2 = out bias with -1e30 on pad lanes (so softmax/argmax ignore them).
    dec_b = jnp.concatenate([params['o_bias'][0::2], params['o_bias'][1::2]])
    row0 = (jnp.zeros((WL,), f32)
            .at[0:H].set(params['attn_bias'])
            .at[H:2 * H].set(params['attn_p_w'][0])
            .at[2 * H:2 * H + DL].set(dec_b))
    row1 = jnp.zeros((WL,), f32).at[0:4 * H].set(params['b_ih'] + params['b_hh'])
    row2 = jnp.full((WL,), -1e30, f32).at[0:V].set(params['out_b'])
    b_slab = jnp.stack([row0, row1, row2], axis=0)

    dims = dict(V=V, E=E, H=H, C=C, LAST=LAST, Vp=Vp)
    return dict(dims=dims, emb=params['emb_w'].astype(f32), w_slab=w_slab, b_slab=b_slab)


class AttnDecoder:
    """forward(): one decode step (== the PyTorch module's forward);
    decode(): the full T-step loop fused into a single pallas_call."""

    def __init__(self, params):
        packed = prepare_params(params)
        self.dims = packed['dims']
        self.emb = packed['emb']
        self.w_slab = packed['w_slab']
        self.b_slab = packed['b_slab']
        self._jitted = {}

    def _get(self, T, L, greedy):
        key = (T, L, greedy)
        if key not in self._jitted:
            call = _build_call(self.dims, T, L, greedy)
            V = self.dims['V']

            def run(tokens, hidden_s, hidden_c, enc, actx, emb, w_slab, b_slab):
                tokens = jnp.clip(tokens.astype(jnp.int32), 0, V - 1)
                hc0 = jnp.concatenate([hidden_s, hidden_c], axis=0).astype(jnp.float32)
                encactx = jnp.concatenate([enc, actx], axis=-1).astype(jnp.float32)
                logp, hc, attn, toks = call(tokens, hc0, encactx, emb, w_slab, b_slab)
                return logp[:, :V], hc[0:1, :], hc[1:2, :], attn, toks

            self._jitted[key] = jax.jit(run)
        return self._jitted[key]

    def forward(self, prev_word, hidden_s, hidden_c, enc, actx):
        L = enc.shape[0]
        run = self._get(1, L, False)
        logp, h, c, attn, _ = run(prev_word.reshape(1), hidden_s, hidden_c, enc, actx,
                                  self.emb, self.w_slab, self.b_slab)
        return logp, h, c, attn.reshape(L, 1)

    def decode(self, tokens, hidden_s, hidden_c, enc, actx, greedy):
        L = enc.shape[0]
        T = tokens.shape[0]
        run = self._get(T, L, bool(greedy))
        return run(tokens, hidden_s, hidden_c, enc, actx, self.emb, self.w_slab, self.b_slab)


# ---------------------------------------------------------------------------------------------
# Pure-JAX reference (mirrors the PyTorch forward in eval mode) and test harness
# ---------------------------------------------------------------------------------------------
def reference_forward(params, prev_word, h, c, enc, actx):
    H = h.shape[-1]
    x = params['emb_w'][prev_word[0]][None]
    pre = jnp.tanh(h @ params['attn_h_w'].T + actx + params['attn_bias'])
    scores = pre @ params['attn_p_w'].T + params['attn_p_b']
    aw = jax.nn.softmax(scores, axis=0)
    ctx = (enc.T @ aw)[:, 0][None]
    xi = jnp.concatenate([x, ctx], -1)
    gates = xi @ params['w_ih'].T + params['b_ih'] + h @ params['w_hh'].T + params['b_hh']
    ig = jax.nn.sigmoid(gates[:, :H])
    fg = jax.nn.sigmoid(gates[:, H:2 * H])
    gg = jnp.tanh(gates[:, 2 * H:3 * H])
    og = jax.nn.sigmoid(gates[:, 3 * H:4 * H])
    cn = fg * c + ig * gg
    hn = og * jnp.tanh(cn)
    d = hn @ params['ho_w'].T + x @ params['eo_w'].T + ctx @ params['co_w'].T + params['o_bias']
    pooled = jnp.max(d.reshape(-1, 2), axis=1)[None]          # MaxPool1d(2, stride=2)
    logits = pooled @ params['out_w'].T + params['out_b']
    return jax.nn.log_softmax(logits, -1), hn, cn, aw


def init_params(key, V, E, H, C, LAST):
    DL = 2 * LAST
    ks = jax.random.split(key, 18)

    def rnd(k, shape, scale=0.1):
        return (scale * jax.random.normal(k, shape)).astype(jnp.float32)

    return dict(
        emb_w=rnd(ks[0], (V, E), 1.0),
        init_h_w=rnd(ks[1], (H, H)), init_h_b=rnd(ks[2], (H,)),
        attn_h_w=rnd(ks[3], (H, H)), attn_c_w=rnd(ks[4], (H, C)), attn_bias=rnd(ks[5], (H,)),
        attn_p_w=rnd(ks[6], (1, H)), attn_p_b=rnd(ks[7], (1,)),
        w_ih=rnd(ks[8], (4 * H, E + C)), w_hh=rnd(ks[9], (4 * H, H)),
        b_ih=rnd(ks[10], (4 * H,)), b_hh=rnd(ks[11], (4 * H,)),
        ho_w=rnd(ks[12], (DL, H)), eo_w=rnd(ks[13], (DL, E)), co_w=rnd(ks[14], (DL, C)),
        o_bias=rnd(ks[15], (DL,)),
        out_w=rnd(ks[16], (V, LAST)), out_b=rnd(ks[17], (V,)),
    )


if __name__ == "__main__":
    key = jax.random.PRNGKey(0)
    V, E, H, L = 50, 32, 32, 8          # len_dict, embedding_size, hidden_size, encoder seq len
    C = 2 * H                           # context_size = 2 * hidden_size
    LAST = (H + 1) // 2                 # last_hidden_size
    params = init_params(key, V, E, H, C, LAST)

    k_enc, _ = jax.random.split(jax.random.fold_in(key, 99))
    enc = jax.random.normal(k_enc, (L, C), jnp.float32)        # encoder_outputs (batch squeezed)
    prev_word = jnp.array([3], jnp.int32)
    # get_initial_states / attn_contxt (run once per sentence, outside the decode loop)
    hidden_s = jnp.tanh(enc[0:1, H:] @ params['init_h_w'].T + params['init_h_b'])   # (1, H)
    hidden_c = jnp.zeros((1, H), jnp.float32)
    attn_ctx = enc @ params['attn_c_w'].T                                            # (L, H)

    dec = AttnDecoder(params)

    # (1) single step == module forward(); compare against the pure-JAX reference.
    outs = jax.block_until_ready(dec.forward(prev_word, hidden_s, hidden_c, enc, attn_ctx))
    refs = reference_forward(params, prev_word, hidden_s, hidden_c, enc, attn_ctx)
    for name, o, r in zip(["word_log_probs", "hidden_s", "hidden_c", "attn_weights"], outs, refs):
        assert o.shape == r.shape, (name, o.shape, r.shape)
        assert jnp.allclose(o, r, atol=5e-2, rtol=5e-2), name

    # (2) fused T-step teacher-forced loop (train_sentence inner loop) in ONE pallas_call.
    T = 8
    tf_tokens = jax.random.randint(jax.random.fold_in(key, 7), (T,), 0, V, dtype=jnp.int32)
    logp_tf, h_tf, c_tf, attn_tf, _ = jax.block_until_ready(
        dec.decode(tf_tokens, hidden_s, hidden_c, enc, attn_ctx, greedy=False))
    h_r, c_r = hidden_s, hidden_c
    for t in range(T):
        lp_r, h_r, c_r, aw_r = reference_forward(params, tf_tokens[t:t + 1], h_r, c_r, enc, attn_ctx)
        assert jnp.allclose(logp_tf[t], lp_r[0], atol=5e-2, rtol=5e-2), ("tf_logp", t)
        assert jnp.allclose(attn_tf[t], aw_r[:, 0], atol=5e-2, rtol=5e-2), ("tf_attn", t)
    assert jnp.allclose(h_tf, h_r, atol=5e-2, rtol=5e-2)
    assert jnp.allclose(c_tf, c_r, atol=5e-2, rtol=5e-2)

    # (3) fused greedy decode (decode_sentence inner loop): in-kernel argmax token feedback.
    sos = jnp.full((T,), prev_word[0], jnp.int32)              # only element 0 is consumed
    logp_g, h_g, c_g, attn_g, toks_g = jax.block_until_ready(
        dec.decode(sos, hidden_s, hidden_c, enc, attn_ctx, greedy=True))
    assert bool(jnp.all(jnp.isfinite(logp_g)))
    assert bool(jnp.all((toks_g >= 0) & (toks_g < V)))
    assert bool(jnp.all(toks_g == jnp.argmax(logp_g, axis=-1)))   # in-kernel argmax consistent
    # Replay the kernel's own token choices through the reference (robust to near-tie argmax).
    h_r, c_r = hidden_s, hidden_c
    prev = prev_word
    for t in range(T):
        lp_r, h_r, c_r, _ = reference_forward(params, prev, h_r, c_r, enc, attn_ctx)
        assert jnp.allclose(logp_g[t], lp_r[0], atol=5e-2, rtol=5e-2), ("greedy_logp", t)
        prev = toks_g[t:t + 1]

    print("KERNEL_OK")
</pallas_src>

<mosaic_0001>
module attributes {stable_mosaic.version = 11 : i64} {
  func.func @kernel(%arg0: memref<1xi32, #tpu.memory_space<smem>>, %arg1: memref<2x32xf32, #tpu.memory_space<vmem>>, %arg2: memref<8x96xf32, #tpu.memory_space<vmem>>, %arg3: memref<50x32xf32, #tpu.memory_space<vmem>>, %arg4: memref<304x128xbf16, #tpu.memory_space<vmem>>, %arg5: memref<3x128xf32, #tpu.memory_space<vmem>>, %arg6: memref<1x128xf32, #tpu.memory_space<vmem>>, %arg7: memref<2x32xf32, #tpu.memory_space<vmem>>, %arg8: memref<1x8xf32, #tpu.memory_space<vmem>>, %arg9: memref<1xi32, #tpu.memory_space<smem>>, %arg10: memref<1x1xi32, #tpu.memory_space<vmem>>) attributes {dimension_semantics = [], scalar_prefetch = 0 : i64, scratch_operands = 1 : i64, tpu.core_type = #tpu.core_type<tc>} {
    %c0 = arith.constant 0 : index
    %c0_0 = arith.constant 0 : index
    %0 = vector.load %arg4[%c0, %c0_0] : memref<304x128xbf16, #tpu.memory_space<vmem>>, vector<128x128xbf16>
    %c128 = arith.constant 128 : index
    %c0_1 = arith.constant 0 : index
    %1 = vector.load %arg4[%c128, %c0_1] : memref<304x128xbf16, #tpu.memory_space<vmem>>, vector<128x32xbf16>
    %c256 = arith.constant 256 : index
    %c0_2 = arith.constant 0 : index
    %2 = vector.load %arg4[%c256, %c0_2] : memref<304x128xbf16, #tpu.memory_space<vmem>>, vector<32x32xbf16>
    %c288 = arith.constant 288 : index
    %c0_3 = arith.constant 0 : index
    %3 = vector.load %arg4[%c288, %c0_3] : memref<304x128xbf16, #tpu.memory_space<vmem>>, vector<16x128xbf16>
    %c0_4 = arith.constant 0 : index
    %c0_5 = arith.constant 0 : index
    %4 = vector.load %arg5[%c0_4, %c0_5] : memref<3x128xf32, #tpu.memory_space<vmem>>, vector<1x32xf32>
    %c0_6 = arith.constant 0 : index
    %c32 = arith.constant 32 : index
    %5 = vector.load %arg5[%c0_6, %c32] : memref<3x128xf32, #tpu.memory_space<vmem>>, vector<1x32xf32>
    %6 = arith.truncf %5 : vector<1x32xf32> to vector<1x32xbf16>
    %c0_7 = arith.constant 0 : index
    %c64 = arith.constant 64 : index
    %7 = vector.load %arg5[%c0_7, %c64] : memref<3x128xf32, #tpu.memory_space<vmem>>, vector<1x32xf32>
    %c1 = arith.constant 1 : index
    %c0_8 = arith.constant 0 : index
    %8 = vector.load %arg5[%c1, %c0_8] : memref<3x128xf32, #tpu.memory_space<vmem>>, vector<1x128xf32>
    %c2 = arith.constant 2 : index
    %c0_9 = arith.constant 0 : index
    %9 = vector.load %arg5[%c2, %c0_9] : memref<3x128xf32, #tpu.memory_space<vmem>>, vector<1x128xf32>
    %c0_10 = arith.constant 0 : index
    %c0_11 = arith.constant 0 : index
    %10 = vector.load %arg2[%c0_10, %c0_11] : memref<8x96xf32, #tpu.memory_space<vmem>>, vector<8x64xf32>
    %11 = arith.truncf %10 : vector<8x64xf32> to vector<8x64xbf16>
    %c0_12 = arith.constant 0 : index
    %c64_13 = arith.constant 64 : index
    %12 = vector.load %arg2[%c0_12, %c64_13] : memref<8x96xf32, #tpu.memory_space<vmem>>, vector<8x32xf32>
    %c0_14 = arith.constant 0 : index
    %c0_15 = arith.constant 0 : index
    %13 = vector.load %arg1[%c0_14, %c0_15] : memref<2x32xf32, #tpu.memory_space<vmem>>, vector<2x32xf32>
    %c0_16 = arith.constant 0 : index
    %c0_17 = arith.constant 0 : index
    %14 = vector.load %arg7[%c0_16, %c0_17] : memref<2x32xf32, #tpu.memory_space<vmem>>, vector<2x32xf32>
    tpu.vector_store %arg7[%c0_16, %c0_17], %13 {strides = array<i32>} : memref<2x32xf32, #tpu.memory_space<vmem>>, vector<2x32xf32>,
    %c0_18 = arith.constant 0 : index
    %15 = memref.load %arg0[%c0_18] : memref<1xi32, #tpu.memory_space<smem>>
    %16 = arith.index_cast %15 : i32 to index
    %c0_19 = arith.constant 0 : index
    %17 = vector.load %arg3[%16, %c0_19] : memref<50x32xf32, #tpu.memory_space<vmem>>, vector<1x32xf32>
    %c0_20 = arith.constant 0 : index
    %c0_21 = arith.constant 0 : index
    %18 = vector.load %arg7[%c0_20, %c0_21] : memref<2x32xf32, #tpu.memory_space<vmem>>, vector<1x32xf32>
    %c1_22 = arith.constant 1 : index
    %c0_23 = arith.constant 0 : index
    %19 = vector.load %arg7[%c1_22, %c0_23] : memref<2x32xf32, #tpu.memory_space<vmem>>, vector<1x32xf32>
    %20 = arith.truncf %18 : vector<1x32xf32> to vector<1x32xbf16>
    %cst = arith.constant dense<0.000000e+00> : vector<1x32xf32>
    %21 = tpu.matmul %20, %2, %cst {dimension_numbers = #tpu.dot_dimension_numbers<[1], [0], [0], [1], [0, 0, 1, 1], [], []>} : vector<1x32xbf16>, vector<32x32xbf16>, vector<1x32xf32> -> vector<1x32xf32>
    %22 = vector.broadcast %21 : vector<1x32xf32> to vector<8x32xf32>
    %23 = arith.addf %22, %12 : vector<8x32xf32>
    %24 = vector.broadcast %4 : vector<1x32xf32> to vector<8x32xf32>
    %25 = arith.addf %23, %24 : vector<8x32xf32>
    %26 = math.tanh %25 : vector<8x32xf32>
    %27 = arith.truncf %26 : vector<8x32xf32> to vector<8x32xbf16>
    "tpu.trace_start"() <{level = 10 : i32, message = "ah,lh->al"}> : () -> ()
    %cst_24 = arith.constant dense<0.000000e+00> : vector<1x8xf32>
    %28 = tpu.matmul %6, %27, %cst_24 {dimension_numbers = #tpu.dot_dimension_numbers<[1], [1], [0], [0], [0, 0, 1, 0], [], []>} : vector<1x32xbf16>, vector<8x32xbf16>, vector<1x8xf32> -> vector<1x8xf32>
    "tpu.trace_stop"() : () -> ()
    %cst_25 = arith.constant dense<0xFF800000> : vector<1xf32>
    %29 = vector.multi_reduction <maximumf>, %28, %cst_25 [1] : vector<1x8xf32> to vector<1xf32>
    %30 = vector.shape_cast %29 : vector<1xf32> to vector<1x1xf32>
    %31 = vector.broadcast %30 : vector<1x1xf32> to vector<1x8xf32>
    %32 = arith.subf %28, %31 : vector<1x8xf32>
    %33 = math.exp %32 : vector<1x8xf32>
    %cst_26 = arith.constant dense<0.000000e+00> : vector<1xf32>
    %34 = vector.multi_reduction <add>, %33, %cst_26 [1] : vector<1x8xf32> to vector<1xf32>
    %35 = vector.shape_cast %34 : vector<1xf32> to vector<1x1xf32>
    %36 = vector.broadcast %35 : vector<1x1xf32> to vector<1x8xf32>
    %37 = arith.divf %33, %36 : vector<1x8xf32>
    %c0_27 = arith.constant 0 : index
    %c0_28 = arith.constant 0 : index
    %38 = vector.load %arg8[%c0_27, %c0_28] : memref<1x8xf32, #tpu.memory_space<vmem>>, vector<1x8xf32>
    tpu.vector_store %arg8[%c0_27, %c0_28], %37 {strides = array<i32>} : memref<1x8xf32, #tpu.memory_space<vmem>>, vector<1x8xf32>,
    %39 = arith.truncf %37 : vector<1x8xf32> to vector<1x8xbf16>
    %cst_29 = arith.constant dense<0.000000e+00> : vector<1x64xf32>
    %40 = tpu.matmul %39, %11, %cst_29 {dimension_numbers = #tpu.dot_dimension_numbers<[1], [0], [0], [1], [0, 0, 1, 1], [], []>} : vector<1x8xbf16>, vector<8x64xbf16>, vector<1x64xf32> -> vector<1x64xf32>
    %41 = tpu.concatenate %17, %40 in 1 : vector<1x32xf32>, vector<1x64xf32> -> vector<1x96xf32>
    %42 = tpu.concatenate %41, %18 in 1 : vector<1x96xf32>, vector<1x32xf32> -> vector<1x128xf32>
    %43 = arith.truncf %42 : vector<1x128xf32> to vector<1x128xbf16>
    %cst_30 = arith.constant dense<0.000000e+00> : vector<1x128xf32>
    %44 = tpu.matmul %43, %0, %cst_30 {dimension_numbers = #tpu.dot_dimension_numbers<[1], [0], [0], [1], [0, 0, 1, 1], [], []>} : vector<1x128xbf16>, vector<128x128xbf16>, vector<1x128xf32> -> vector<1x128xf32>
    %45 = arith.addf %44, %8 : vector<1x128xf32>
    %46 = arith.negf %45 : vector<1x128xf32>
    %47 = math.exp %46 : vector<1x128xf32>
    %cst_31 = arith.constant 1.000000e+00 : f32
    %48 = vector.broadcast %cst_31 : f32 to vector<1x128xf32>
    %49 = arith.addf %48, %47 : vector<1x128xf32>
    %50 = arith.divf %48, %49 : vector<1x128xf32>
    %51 = math.tanh %45 : vector<1x128xf32>
    %52 = vector.extract_strided_slice %50 {offsets = [0, 32], sizes = [1, 32], strides = [1, 1]} : vector<1x128xf32> to vector<1x32xf32>
    %53 = arith.mulf %52, %19 : vector<1x32xf32>
    %54 = vector.extract_strided_slice %50 {offsets = [0, 0], sizes = [1, 32], strides = [1, 1]} : vector<1x128xf32> to vector<1x32xf32>
    %55 = vector.extract_strided_slice %51 {offsets = [0, 64], sizes = [1, 32], strides = [1, 1]} : vector<1x128xf32> to vector<1x32xf32>
    %56 = arith.mulf %54, %55 : vector<1x32xf32>
    %57 = arith.addf %53, %56 : vector<1x32xf32>
    %58 = vector.extract_strided_slice %50 {offsets = [0, 96], sizes = [1, 32], strides = [1, 1]} : vector<1x128xf32> to vector<1x32xf32>
    %59 = math.tanh %57 : vector<1x32xf32>
    %60 = arith.mulf %58, %59 : vector<1x32xf32>
    %c0_32 = arith.constant 0 : index
    %c0_33 = arith.constant 0 : index
    %61 = vector.load %arg7[%c0_32, %c0_33] : memref<2x32xf32, #tpu.memory_space<vmem>>, vector<1x32xf32>
    tpu.vector_store %arg7[%c0_32, %c0_33], %60 {strides = array<i32>} : memref<2x32xf32, #tpu.memory_space<vmem>>, vector<1x32xf32>,
    %c1_34 = arith.constant 1 : index
    %c0_35 = arith.constant 0 : index
    %62 = vector.load %arg7[%c1_34, %c0_35] : memref<2x32xf32, #tpu.memory_space<vmem>>, vector<1x32xf32>
    tpu.vector_store %arg7[%c1_34, %c0_35], %57 {strides = array<i32>} : memref<2x32xf32, #tpu.memory_space<vmem>>, vector<1x32xf32>,
    %63 = tpu.concatenate %41, %60 in 1 : vector<1x96xf32>, vector<1x32xf32> -> vector<1x128xf32>
    %64 = arith.truncf %63 : vector<1x128xf32> to vector<1x128xbf16>
    %cst_36 = arith.constant dense<0.000000e+00> : vector<1x32xf32>
    %65 = tpu.matmul %64, %1, %cst_36 {dimension_numbers = #tpu.dot_dimension_numbers<[1], [0], [0], [1], [0, 0, 1, 1], [], []>} : vector<1x128xbf16>, vector<128x32xbf16>, vector<1x32xf32> -> vector<1x32xf32>
    %66 = arith.addf %65, %7 : vector<1x32xf32>
    %67 = vector.extract_strided_slice %66 {offsets = [0, 0], sizes = [1, 16], strides = [1, 1]} : vector<1x32xf32> to vector<1x16xf32>
    %68 = vector.extract_strided_slice %66 {offsets = [0, 16], sizes = [1, 16], strides = [1, 1]} : vector<1x32xf32> to vector<1x16xf32>
    %69 = arith.maximumf %67, %68 : vector<1x16xf32>
    %70 = arith.truncf %69 : vector<1x16xf32> to vector<1x16xbf16>
    %cst_37 = arith.constant dense<0.000000e+00> : vector<1x128xf32>
    %71 = tpu.matmul %70, %3, %cst_37 {dimension_numbers = #tpu.dot_dimension_numbers<[1], [0], [0], [1], [0, 0, 1, 1], [], []>} : vector<1x16xbf16>, vector<16x128xbf16>, vector<1x128xf32> -> vector<1x128xf32>
    %72 = arith.addf %71, %9 : vector<1x128xf32>
    %cst_38 = arith.constant dense<0xFF800000> : vector<1xf32>
    %73 = vector.multi_reduction <maximumf>, %72, %cst_38 [1] : vector<1x128xf32> to vector<1xf32>
    %74 = vector.shape_cast %73 : vector<1xf32> to vector<1x1xf32>
    %75 = vector.broadcast %74 : vector<1x1xf32> to vector<1x128xf32>
    %76 = arith.subf %72, %75 : vector<1x128xf32>
    %77 = math.exp %76 : vector<1x128xf32>
    %cst_39 = arith.constant dense<0.000000e+00> : vector<1xf32>
    %78 = vector.multi_reduction <add>, %77, %cst_39 [1] : vector<1x128xf32> to vector<1xf32>
    %79 = vector.shape_cast %78 : vector<1xf32> to vector<1x1xf32>
    %80 = math.log %79 : vector<1x1xf32>
    %81 = vector.broadcast %80 : vector<1x1xf32> to vector<1x128xf32>
    %82 = arith.subf %76, %81 : vector<1x128xf32>
    %c0_40 = arith.constant 0 : index
    %c0_41 = arith.constant 0 : index
    %83 = vector.load %arg6[%c0_40, %c0_41] : memref<1x128xf32, #tpu.memory_space<vmem>>, vector<1x128xf32>
    tpu.vector_store %arg6[%c0_40, %c0_41], %82 {strides = array<i32>} : memref<1x128xf32, #tpu.memory_space<vmem>>, vector<1x128xf32>,
    %84 = tpu.iota {dimensions = array<i32: 1>} : vector<1x128xi32>
    %85 = vector.broadcast %74 : vector<1x1xf32> to vector<1x128xf32>
    %86 = arith.cmpf oge, %72, %85 : vector<1x128xf32>
    %c128_i32 = arith.constant 128 : i32
    %87 = vector.broadcast %c128_i32 : i32 to vector<1x128xi32>
    %88 = arith.select %86, %84, %87 : vector<1x128xi1>, vector<1x128xi32>
    %cst_42 = arith.constant dense<2147483647> : vector<1xi32>
    %89 = vector.multi_reduction <minsi>, %88, %cst_42 [1] : vector<1x128xi32> to vector<1xi32>
    %90 = vector.shape_cast %89 : vector<1xi32> to vector<1x1xi32>
    %c0_43 = arith.constant 0 : index
    %c0_44 = arith.constant 0 : index
    %91 = vector.load %arg10[%c0_43, %c0_44] : memref<1x1xi32, #tpu.memory_space<vmem>>, vector<1x1xi32>
    tpu.vector_store %arg10[%c0_43, %c0_44], %90 {strides = array<i32>} : memref<1x1xi32, #tpu.memory_space<vmem>>, vector<1x1xi32>,
    %c0_45 = arith.constant 0 : index
    %c0_46 = arith.constant 0 : index
    %92 = vector.load %arg10[%c0_45, %c0_46] : memref<1x1xi32, #tpu.memory_space<vmem>>, vector<1x1xi32>
    %93 = vector.extract %92[0, 0] : i32 from vector<1x1xi32>
    %c0_47 = arith.constant 0 : index
    %94 = memref.load %arg9[%c0_47] : memref<1xi32, #tpu.memory_space<smem>>
    memref.store %93, %arg9[%c0_47] : memref<1xi32, #tpu.memory_space<smem>>
    return
  }
}

</mosaic_0001>

<bundles_post_ra>
// kernel: run.1
= control target key start
LH: loop header
LB: loop body
LE: loop exit
PB: predicated region body
PF: predicated region fallthrough
CT: control target
= control target key end

     0   :  { %16 = vsyncpa [#allocation5], 0  ;;  %s1115_s0 = inlined_call_operand.<no memory space> [shape: s32[1], index: 0, kind: input, shape index: {}]   ;;  %s1116_s1 = inlined_call_operand.vmem [shape: f32[2,32], index: 1, kind: input, shape index: {}]   ;;  %s1117_s2 = inlined_call_operand.vmem [shape: f32[8,96], index: 2, kind: input, shape index: {}]   ;;  %s1118_s3 = inlined_call_operand.vmem [shape: f32[50,32], index: 3, kind: input, shape index: {}]   ;;  %s1119_s4 = inlined_call_operand.hbm [shape: bf16[304,128], index: 4, kind: input, shape index: {}]   ;;  %s1120_s5 = inlined_call_operand.vmem [shape: f32[3,128], index: 5, kind: input, shape index: {}]   ;;  %s1121_s6 = inlined_call_operand.hbm [shape: f32[1,128], index: 6, kind: output, shape index: {0}]   ;;  %s1122_s7 = inlined_call_operand.vmem [shape: f32[2,32], index: 7, kind: output, shape index: {1}]   ;;  %s1123_s8 = inlined_call_operand.hbm [shape: f32[1,8], index: 8, kind: output, shape index: {2}]   ;;  %s1124_s9 = inlined_call_operand.hbm [shape: s32[1], index: 9, kind: output, shape index: {3}]  }
   0x1   :  { %17 = vsyncpa [#allocation6], 0 }
   0x2   :  { %18 = vsyncpa [#allocation10], 0 }
   0x3   :  { %19 = vsyncpa [#allocation7], 0  ;;  %s908_s30 = smov [#allocation4]   ;;  %s824_s13 = scalar_lea.hbm %s1119_s4, 2432 }
   0x4   :  { %s33_s10 = sshll.u32 %s908_s30, 4  ;;  %p825_p0 = scmp.ne.s32.totalorder %s1119_s4, %s824_s13  ;;  %s34_s10 = int_to_ptr.vmem [resolvable:$true] %s33_s10 }
   0x5   :  { %p828_p1 = scmp.lt.u32.totalorder %s824_s13, %s1119_s4 }
   0x7   :  { %p830_p2 = pnand %p828_p1, %p825_p0 }
   0x9   :  { %833 = shalt.err (!%p830_p2)
}
   0xa   :  { %s834_s18 = scalar_lea.vmem %s34_s10, 2432  ;;  %p839_p4 = scmp.lt.s32.totalorder %s34_s10, %s34_s10 }
   0xb   :  { %p835_p3 = scmp.ne.s32.totalorder %s34_s10, %s834_s18  ;;  %p840_p5 = scmp.lt.s32.totalorder %s834_s18, %s834_s18 }
   0xd   :  { %p841_p6 = por %p840_p5, %p839_p4 }
   0xf   :  { %p842_p7 = pnand %p841_p6, %p835_p3 }
  0x11   :  { %845 = shalt.err (!%p842_p7)
}
  0x12   :  { %s909_s19 = smov 64   ;;  %s910_s20 = smov 4  }
  0x13   :  { %39 = dma.hbm_to_vmem [thread:$0]  %s1119_s4, 2432, %s34_s10, [#allocation5], %s909_s19, %s909_s19, %s910_s20  }
  0x14   :  { %900 = dma.done.wait [#allocation5], 2432  }
  0x15   :  { %901 = vsyncadd [#allocation5], 4294964864  ;;  %v911_v0 = vmov 0.0   ;;  %vm912_vm0 = vmmov 0   ;;  %v787_v1 = vld [vmem:[#allocation4 + $0x80] sm:$0xff]   ;;  %vm91_vm1 = vcmask 254976   ;;  %v155_v9 = vlaneseq  ;;  %s94_s15 = scalar_lea.vmem %s1118_s3, %s1115_s0 }
  0x16   :  { %708 = vmatprep.subr.bf16.mxu0 %v911_v0  ;;  %712 = vmatprep.mubr.msk.bf16.mxu0 %vm912_vm0, %v911_v0  ;;  %v788_v2 = vld [vmem:[#allocation4 + $0x88] sm:$0xff]   ;;  %v90_v3 = vld [vmem:[%s1116_s1] sm:$0x3]  ;;  %vm111_vm2 = vcmask 261120   ;;  %s913_s1 = smov 96   ;;  %vm220_vm3 = vcmask 57344  }
  0x17   :  { %716 = vmatprep.subr.bf16.mxu1 %v911_v0  ;;  %718 = vmatprep.mubr.msk.bf16.mxu1 %vm912_vm0, %v911_v0  ;;  %v88_v4 = vld [vmem:[%s1117_s2] sm:$0xff]  ;;  %92 = vst.msk [vmem:[%s1122_s7] sm:$0x3] %vm91_vm1, %v90_v3  ;;  %v156_v10 = vshrl.u32 %v155_v9, 7  ;;  %vm238_vm4 = vcmask 1043456   ;;  %vm234_vm5 = vcmask 64512  }
  0x18   :  { %709 = vmatpush3.bf16.msra.mxu0 %v787_v1  ;;  %v84_v5 = vld [vmem:[%s1120_s5] sm:$0x1]  ;;  %160 = vrot.lane.b32.xlu0 %v88_v4, %s909_s19  ;;  %v89_v35 = vpack.c.bf16 %v88_v4, %v88_v4  ;;  %v789_v41 = vld [vmem:[#allocation4] sm:$0xff]   ;;  %v790_v42 = vld [vmem:[#allocation4 + $0x8] sm:$0xff]   ;;  %s914_s10 = smov 32   ;;  %vm291_vm6 = vcmask 785408  }
  0x19   :  { %710 = vmatprep.subr.bf16.mxu0 %v911_v0  ;;  %v85_v6 = vpack.c.bf16 %v84_v5, %v84_v5  ;;  %v157_v11 = vsub.s32 0, %v156_v10  ;;  %v791_v43 = vld [vmem:[#allocation4 + $0x10] sm:$0xff]   ;;  %v792_v44 = vld [vmem:[#allocation4 + $0x18] sm:$0xff]   ;;  %v793_v45 = vld [vmem:[#allocation4 + $0x20] sm:$0xff]   ;;  %s915_s18 = smov 112   ;;  %vm527_vm7 = vcmask 130048  }
  0x1a   :  { %v240_v36 = vsel %vm238_vm4, %v89_v35, 0  ;;  %v794_v46 = vld [vmem:[#allocation4 + $0x28] sm:$0xff]   ;;  %v795_v47 = vld [vmem:[#allocation4 + $0x30] sm:$0xff]   ;;  %v796_v48 = vld [vmem:[#allocation4 + $0x38] sm:$0xff]   ;;  %vm571_vm8 = vcmask 1040384   ;;  %vm414_vm11 = vcmask 253952  }
  0x1b   :  { %v167_v16 = vrot.slane %v84_v5, %v157_v11  ;;  %v95_v53 = vld [vmem:[%s94_s15] sm:$0x1]  ;;  %v86_v59 = vld [vmem:[%s1120_s5 + $0x1] sm:$0x1]  ;;  %s916_s22 = smov [#allocation8]   ;;  %s917_s4 = smov [#allocation9]  }
  0x1c   :  { %711 = vmatpush3.bf16.msra.mxu0 %v788_v2  ;;  %172 = vrot.lane.b32.xlu0 %v85_v6, %s913_s1  ;;  %s616_s23 = sshll.u32 %s916_s22, 4  ;;  %s628_s24 = sshll.u32 %s917_s4, 4  ;;  %s617_s23 = int_to_ptr.vmem [resolvable:$true] %s616_s23  ;;  %s629_s24 = int_to_ptr.vmem [resolvable:$true] %s628_s24 }
  0x1d   :  { %722 = vmatprep.subr.bf16.mxu0 %v911_v0  ;;  %s846_s25 = scalar_lea.vmem %s617_s23, 16  ;;  %s850_s26 = scalar_lea.vmem %s617_s23, 32 }
  0x1e   :  { %v96_v7 = vld [vmem:[%s1122_s7] sm:$0x1]  ;;  %v97_v3 = vld [vmem:[%s1122_s7 + $0x1] sm:$0x1]  ;;  %p847_p8 = scmp.ne.s32.totalorder %s617_s23, %s846_s25  ;;  %p851_p9 = scmp.lt.s32.totalorder %s617_s23, %s617_s23 }
  0x1f   :  { %v98_v8 = vpack.c.bf16 %v96_v7, %v96_v7  ;;  %p852_p10 = scmp.lt.s32.totalorder %s850_s26, %s846_s25 }
  0x21   :  { %713 = vmatmul.mubr.msk.bf16.vlgmr.msra.gmra.mrb[0].mxu0 %vm111_vm2, %v98_v8  ;;  %p853_p11 = por %p852_p10, %p851_p9 }
  0x22   :  { %724 = vmatprep.mubr.msk.bf16.mxu0 %vm912_vm0, %v911_v0  ;;  %723 = vmatpush3.bf16.msra.mxu0 %v240_v36 }
  0x23   :  { %748 = vmatprep.subr.bf16.mxu0 %v911_v0  ;;  %p854_p12 = pnand %p853_p11, %p847_p8 }
  0x8a   :  { %v161_v13 = vpop.permute.xlu0 %160 }
  0x8e   :  { %v173_v24 = vpop.permute.xlu0 %172 }
  0xf4   :  { %v149_v12 = vpop.f32.mrb[0].mxu0 }
  0xf5   :  { %v158_v14 = vrot.slane %v149_v12, %v157_v11  ;;  %v714_v15 = vpop.f32.mrb[1].mxu0  ;;  %v797_v11 = vld [vmem:[#allocation4 + $0x40] sm:$0xff]   ;;  %v798_v12 = vld [vmem:[#allocation4 + $0x48] sm:$0xff]  }
  0xf6   :  { %v152_v17 = vpop.f32.mrb[2].mxu0  ;;  %v801_v15 = vld [vmem:[#allocation4 + $0x60] sm:$0xff]  }
  0xf7   :  { %v163_v18 = vadd.f32 %v161_v13, %v158_v14  ;;  %v715_v19 = vpop.f32.mrb[3].mxu0  ;;  %v799_v13 = vld [vmem:[#allocation4 + $0x50] sm:$0xff]   ;;  %v800_v14 = vld [vmem:[#allocation4 + $0x58] sm:$0xff]  }
  0xf8   :  { %v803_v17 = vld [vmem:[#allocation4 + $0x70] sm:$0xff]  }
  0xf9   :  { %v168_v20 = vadd.f32 %v167_v16, %v163_v18  ;;  %v802_v16 = vld [vmem:[#allocation4 + $0x68] sm:$0xff]  }
  0xfb   :  { %806 = vtanh.f32 %v168_v20 }
 0x105   :  { %v807_v21 = vpop.eup %806 }
 0x106   :  { %v170_v22 = vpack.c.bf16 %v807_v21, %v807_v21 }
 0x108   :  { %v178_v23 = vsel %vm111_vm2, %v170_v22, 0  ;;  %v804_v22 = vld [vmem:[#allocation4 + $0x78] sm:$0xff]  }
 0x109   :  { %717 = vmatpush3.bf16.xpose.msra.mxu1 %v178_v23 }
 0x10a   :  { %728 = vmatprep.subr.bf16.mxu1 %v911_v0 }
 0x110   :  { %719 = vmatmul.mubr.msk.bf16.vlgmr.msra.gmra.mrb[0].mxu1 %vm111_vm2, %v173_v24 }
 0x111   :  { %744 = vmatprep.mubr.msk.bf16.mxu1 %vm912_vm0, %v911_v0  ;;  %729 = vmatpush3.bf16.msra.mxu1 %v789_v41 }
 0x112   :  { %730 = vmatprep.subr.bf16.mxu1 %v911_v0 }
 0x115   :  { %731 = vmatpush3.bf16.msra.mxu1 %v790_v42 }
 0x116   :  { %732 = vmatprep.subr.bf16.mxu1 %v911_v0 }
 0x119   :  { %733 = vmatpush3.bf16.msra.mxu1 %v791_v43 }
 0x11a   :  { %734 = vmatprep.subr.bf16.mxu1 %v911_v0 }
 0x11d   :  { %735 = vmatpush3.bf16.msra.mxu1 %v792_v44  ;;  %v586_v44 = vand.u32 127, %v155_v9 }
 0x11e   :  { %736 = vmatprep.subr.bf16.mxu1 %v911_v0 }
 0x121   :  { %737 = vmatpush3.bf16.msra.mxu1 %v793_v45 }
 0x122   :  { %738 = vmatprep.subr.bf16.mxu1 %v911_v0 }
 0x125   :  { %739 = vmatpush3.bf16.msra.mxu1 %v794_v46 }
 0x126   :  { %740 = vmatprep.subr.bf16.mxu1 %v911_v0 }
 0x129   :  { %741 = vmatpush3.bf16.msra.mxu1 %v795_v47 }
 0x12a   :  { %742 = vmatprep.subr.bf16.mxu1 %v911_v0 }
 0x12d   :  { %743 = vmatpush3.bf16.msra.mxu1 %v796_v48 }
 0x12e   :  { %768 = vmatprep.subr.bf16.mxu1 %v911_v0 }
 0x1e3   :  { %v214_v25 = vpop.f32.mrb[0].mxu1 }
 0x1e4   :  { %v720_v26 = vpop.f32.mrb[1].mxu1  ;;  %v221_v27 = vsel %vm220_vm3, %v214_v25, -inf }
 0x1e5   :  { %222 = vmax.xlane.f32.xlu1 %v221_v27  ;;  %v217_v28 = vpop.f32.mrb[2].mxu1 }
 0x1e6   :  { %v721_v29 = vpop.f32.mrb[3].mxu1  ;;  %v805_v28 = vld [vmem:[#allocation4 + $0x90] sm:$0xff]  }
 0x272   :  { %v223_v30 = vpop.xlane.xlu1 %222 }
 0x273   :  { %v224_v31 = vsub.f32 %v214_v25, %v223_v30 }
 0x275   :  { %v225_v32 = vmul.f32 1.442695, %v224_v31 }
 0x277   :  { %808 = vpow2.f32 %v225_v32 }
 0x281   :  { %v809_v33 = vpop.eup %808 }
 0x282   :  { %v227_v34 = vsel %vm220_vm3, %v809_v33, 0.0 }
 0x283   :  { %228 = vadd.xlane.f32.xlu1 %v227_v34 }
 0x294   :  { %288 = vrot.lane.b32.xlu1 %v96_v7, %s913_s1 }
 0x298   :  { %472 = vrot.lane.b32.xlu1 %v84_v5, %s909_s19 }
 0x310   :  { %v229_v37 = vpop.xlane.xlu1 %228 }
 0x311   :  { %810 = vrcp.f32 %v229_v37  ;;  %v87_v37 = vld [vmem:[%s1120_s5 + $0x2] sm:$0x1] }
 0x314   :  { %v289_v54 = vpop.permute.xlu1 %288 }
 0x318   :  { %v473_v29 = vpop.permute.xlu1 %472 }
 0x31b   :  { %v811_v38 = vpop.eup %810 }
 0x31c   :  { %v231_v39 = vmul.f32 %v811_v38, %v809_v33 }
 0x31e   :  { %232 = vst.msk [vmem:[#allocation9] sm:$0x1] %vm220_vm3, %v231_v39  ;;  %v233_v40 = vpack.c.bf16 %v231_v39, %v231_v39 }
 0x320   :  { %725 = vmatmul.mubr.msk.bf16.vlgmr.msra.gmra.mrb[4].mxu0 %vm234_vm5, %v233_v40 }
 0x321   :  { %764 = vmatprep.mubr.msk.bf16.mxu0 %vm912_vm0, %v911_v0  ;;  %749 = vmatpush3.bf16.msra.mxu0 %v797_v11 }
 0x322   :  { %750 = vmatprep.subr.bf16.mxu0 %v911_v0 }
 0x325   :  { %751 = vmatpush3.bf16.msra.mxu0 %v798_v12 }
 0x326   :  { %752 = vmatprep.subr.bf16.mxu0 %v911_v0 }
 0x329   :  { %753 = vmatpush3.bf16.msra.mxu0 %v799_v13 }
 0x32a   :  { %754 = vmatprep.subr.bf16.mxu0 %v911_v0 }
 0x32d   :  { %755 = vmatpush3.bf16.msra.mxu0 %v800_v14 }
 0x32e   :  { %756 = vmatprep.subr.bf16.mxu0 %v911_v0 }
 0x331   :  { %757 = vmatpush3.bf16.msra.mxu0 %v801_v15 }
 0x332   :  { %758 = vmatprep.subr.bf16.mxu0 %v911_v0 }
 0x335   :  { %759 = vmatpush3.bf16.msra.mxu0 %v802_v16 }
 0x336   :  { %760 = vmatprep.subr.bf16.mxu0 %v911_v0 }
 0x339   :  { %761 = vmatpush3.bf16.msra.mxu0 %v803_v17 }
 0x33a   :  { %762 = vmatprep.subr.bf16.mxu0 %v911_v0 }
 0x33d   :  { %763 = vmatpush3.bf16.msra.mxu0 %v804_v22 }
 0x3f3   :  { %v276_v49 = vpop.f32.mrb[4].mxu0 }
 0x3f4   :  { %283 = vrot.lane.b32.xlu0 %v276_v49, %s914_s10  ;;  %v726_v50 = vpop.f32.mrb[5].mxu0 }
 0x3f5   :  { %v279_v51 = vpop.f32.mrb[6].mxu0 }
 0x3f6   :  { %v727_v52 = vpop.f32.mrb[7].mxu0 }
 0x466   :  { %v284_v55 = vpop.permute.xlu0 %283 }
 0x467   :  { %v286_v56 = vsel %vm111_vm2, %v95_v53, %v284_v55 }
 0x468   :  { %v292_v57 = vsel %vm291_vm6, %v286_v56, %v289_v54 }
 0x469   :  { %v293_v58 = vpack.c.bf16 %v292_v57, %v292_v57 }
 0x46b   :  { %745 = vmatmul.mubr.bf16.vlgmr.msra.gmra.mrb[4].mxu1 %v293_v58 }
 0x46c   :  { %770 = vmatprep.mubr.msk.bf16.mxu1 %vm912_vm0, %v911_v0  ;;  %769 = vmatpush3.bf16.msra.mxu1 %v805_v28 }
 0x53e   :  { %v376_v60 = vpop.f32.mrb[4].mxu1 }
 0x53f   :  { %v377_v61 = vadd.f32 %v376_v60, %v86_v59  ;;  %v746_v62 = vpop.f32.mrb[5].mxu1 }
 0x540   :  { %v379_v63 = vpop.f32.mrb[6].mxu1 }
 0x541   :  { %812 = vtanh.f32 %v377_v61  ;;  %v747_v1 = vpop.f32.mrb[7].mxu1  ;;  %v670_v4 = vmul.f32 -1.442695, %v377_v61 }
 0x543   :  { %814 = vpow2.f32 %v670_v4 }
 0x54b   :  { %v813_v2 = vpop.eup %812 }
 0x54c   :  { %395 = vrot.lane.b32.xlu0 %v813_v2, %s909_s19 }
 0x54d   :  { %v815_v5 = vpop.eup %814 }
 0x54e   :  { %v385_v6 = vadd.f32 1.0, %v815_v5 }
 0x550   :  { %390 = vrot.lane.b32.xlu0 %v97_v3, %s914_s10  ;;  %816 = vrcp.f32 %v385_v6 }
 0x55a   :  { %v817_v7 = vpop.eup %816 }
 0x5be   :  { %v396_v8 = vpop.permute.xlu0 %395 }
 0x5bf   :  { %v398_v10 = vmul.f32 %v817_v7, %v396_v8 }
 0x5c1   :  { %400 = vrot.lane.b32.xlu0 %v398_v10, %s914_s10 }
 0x5c2   :  { %v391_v18 = vpop.permute.xlu0 %390 }
 0x5c3   :  { %v393_v19 = vmul.f32 %v817_v7, %v391_v18 }
 0x633   :  { %v401_v20 = vpop.permute.xlu0 %400 }
 0x634   :  { %v403_v21 = vadd.f32 %v401_v20, %v393_v19 }
 0x636   :  { %818 = vtanh.f32 %v403_v21 }
 0x640   :  { %v819_v23 = vpop.eup %818 }
 0x641   :  { %406 = vrot.lane.b32.xlu0 %v819_v23, %s909_s19 }
 0x6b3   :  { %v407_v24 = vpop.permute.xlu0 %406 }
 0x6b4   :  { %v409_v25 = vmul.f32 %v817_v7, %v407_v24 }
 0x6b6   :  { %v421_v26 = vsel %vm291_vm6, %v286_v56, %v409_v25 }
 0x6b7   :  { %v422_v27 = vpack.c.bf16 %v421_v26, %v421_v26 }
 0x6b9   :  { %765 = vmatmul.mubr.bf16.vlgmr.msra.gmra.mrb[8].mxu0 %v422_v27 }
 0x78c   :  { %v509_v0 = vpop.f32.mrb[8].mxu0 }
 0x78d   :  { %v510_v30 = vadd.f32 %v509_v0, %v473_v29  ;;  %v766_v31 = vpop.f32.mrb[9].mxu0 }
 0x78e   :  { %v512_v32 = vpop.f32.mrb[10].mxu0 }
 0x78f   :  { %516 = vrot.lane.b32.xlu0 %v510_v30, %s915_s18  ;;  %v767_v33 = vpop.f32.mrb[11].mxu0 }
 0x801   :  { %v517_v34 = vpop.permute.xlu0 %516 }
 0x802   :  { %v519_v35 = vmax.f32 %v510_v30, %v517_v34 }
 0x804   :  { %v520_v36 = vpack.c.bf16 %v519_v35, %v519_v35 }
 0x806   :  { %771 = vmatmul.mubr.msk.bf16.vlgmr.msra.gmra.mrb[8].mxu1 %vm527_vm7, %v520_v36 }
 0x8d9   :  { %v565_v38 = vpop.f32.mrb[8].mxu1 }
 0x8da   :  { %v566_v39 = vadd.f32 %v565_v38, %v87_v37  ;;  %v772_v40 = vpop.f32.mrb[9].mxu1 }
 0x8db   :  { %v568_v41 = vpop.f32.mrb[10].mxu1 }
 0x8dc   :  { %v773_v42 = vpop.f32.mrb[11].mxu1  ;;  %v572_v43 = vsel %vm571_vm8, %v566_v39, -inf }
 0x8dd   :  { %573 = vmax.xlane.f32.xlu1 %v572_v43 }
 0x96a   :  { %v574_v45 = vpop.xlane.xlu1 %573 }
 0x96b   :  { %v575_v46 = vsub.f32 %v566_v39, %v574_v45  ;;  %vm587_vm9 = vcmp.ge.f32.partialorder %v566_v39, %v574_v45 }
 0x96c   :  { %v588_v47 = vsel %vm587_vm9, %v586_v44, 128 }
 0x96d   :  { %v576_v48 = vmul.f32 1.442695, %v575_v46  ;;  %v589_v49 = vsel %vm571_vm8, %v588_v47, 2147483647 }
 0x96e   :  { %v591_v50 = vshra.s32 %v589_v49, 16  ;;  %v590_v54 = vand.u32 65535, %v589_v49 }
 0x96f   :  { %820 = vpow2.f32 %v576_v48 }
 0x970   :  { %v593_v51 = vcvt.s32.f32 %v591_v50  ;;  %v592_v9 = vcvt.s32.f32 %v590_v54 }
 0x972   :  { %594 = vmin.xlane.f32.xlu0 %v593_v51 }
 0x979   :  { %v821_v52 = vpop.eup %820 }
 0x97a   :  { %v578_v53 = vsel %vm571_vm8, %v821_v52, 0.0 }
 0x97b   :  { %579 = vadd.xlane.f32.xlu1 %v578_v53 }
 0x98c   :  { %417 = vrot.lane.b32.xlu1 %v403_v21, %s913_s1 }
 0x9ff   :  { %v595_v55 = vpop.xlane.xlu0 %594 }
 0xa00   :  { %vm596_vm10 = vcmp.eq.f32.partialorder %v593_v51, %v595_v55 }
 0xa01   :  { %v597_v56 = vsel %vm596_vm10, %v592_v9, inf }
 0xa02   :  { %598 = vmin.xlane.f32.xlu0 %v597_v56 }
 0xa08   :  { %v580_v57 = vpop.xlane.xlu1 %579 }
 0xa09   :  { %822 = vlog2.f32 %v580_v57 }
 0xa0c   :  { %v418_v58 = vpop.permute.xlu1 %417 }
 0xa0d   :  { %420 = vst.msk [vmem:[%s1122_s7 + $0x1] sm:$0x1] %vm414_vm11, %v418_v58 }
 0xa13   :  { %v823_v59 = vpop.eup %822 }
 0xa14   :  { %v582_v60 = vmul.f32 0.6931472, %v823_v59 }
 0xa16   :  { %v583_v61 = vsub.f32 %v575_v46, %v582_v60 }
 0xa18   :  { %411 = vrot.lane.b32.xlu0 %v409_v25, %s914_s10  ;;  %584 = vst [vmem:[#allocation8] sm:$0x1] %v583_v61 }
 0xa19   :  { %857 = shalt.err (!%p854_p12)
}
 0xa1a   :  { %s858_s29 = scalar_lea.hbm %s1121_s6, 16 }
 0xa1b   :  { %p859_p13 = scmp.ne.s32.totalorder %s1121_s6, %s858_s29  ;;  %p862_p0 = scmp.lt.u32.totalorder %s858_s29, %s1121_s6 }
 0xa1d   :  { %p864_p1 = pnand %p862_p0, %p859_p13 }
 0xa1f   :  { %867 = shalt.err (!%p864_p1)
}
 0xa20   :  { %619 = dma.vmem_to_hbm [thread:$0]  %s617_s23, 16, %s1121_s6, [#allocation6]  }
 0xa21   :  { %s868_s13 = scalar_lea.vmem %s629_s24, 16  ;;  %s872_s14 = scalar_lea.vmem %s629_s24, 32 }
 0xa22   :  { %p869_p2 = scmp.ne.s32.totalorder %s629_s24, %s868_s13  ;;  %p873_p3 = scmp.lt.s32.totalorder %s629_s24, %s629_s24 }
 0xa23   :  { %p874_p4 = scmp.lt.s32.totalorder %s872_s14, %s868_s13 }
 0xa25   :  { %p875_p5 = por %p874_p4, %p873_p3 }
 0xa27   :  { %p876_p6 = pnand %p875_p5, %p869_p2 }
 0xa29   :  { %879 = shalt.err (!%p876_p6)
}
 0xa2a   :  { %s880_s17 = scalar_lea.hbm %s1123_s8, 16 }
 0xa2b   :  { %p881_p7 = scmp.ne.s32.totalorder %s1123_s8, %s880_s17  ;;  %p884_p8 = scmp.lt.u32.totalorder %s880_s17, %s1123_s8 }
 0xa2d   :  { %p886_p9 = pnand %p884_p8, %p881_p7 }
 0xa2f   :  { %889 = shalt.err (!%p886_p9)
}
 0xa30   :  { %631 = dma.vmem_to_hbm [thread:$0]  %s629_s24, 16, %s1123_s8, [#allocation10]   ;;  %v601_v62 = vcvt.f32.s32 %v595_v55  ;;  %vm604_vm12 = vcmask 0  }
 0xa31   :  { %s890_s8 = scalar_lea.hbm %s1124_s9, 16 }
 0xa32   :  { %v602_v1 = vshll.u32 %v601_v62, 16  ;;  %p891_p10 = scmp.ne.s32.totalorder %s1124_s9, %s890_s8  ;;  %p894_p11 = scmp.lt.u32.totalorder %s890_s8, %s1124_s9 }
 0xa34   :  { %p896_p12 = pnand %p894_p11, %p891_p10 }
 0xa8f   :  { %v599_v63 = vpop.xlane.xlu0 %598 }
 0xa90   :  { %v600_v2 = vcvt.f32.s32 %v599_v63 }
 0xa92   :  { %v603_v3 = vadd.s32 %v602_v1, %v600_v2 }
 0xa93   :  { %v412_v4 = vpop.permute.xlu0 %411 }
 0xa94   :  { %605 = vst.msk [vmem:[#allocation2] sm:$0x1] %vm604_vm12, %v603_v3 }
 0xa95   :  { %415 = vst.msk [vmem:[%s1122_s7] sm:$0x1] %vm414_vm11, %v412_v4 }
 0xa9b   :  { %v606_v5 = vld [vmem:[#allocation2] sm:$0x1] }
 0xa9c   :  { %774 = vpush %v606_v5 }
 0xacd   :  { %s775_s22 = spop %774 }
 0xace   :  { %609 = sst [smem:[#allocation11]] %s775_s22 }
 0xacf   :  { %899 = shalt.err (!%p896_p12)
}
 0xad0   :  { %s918_s28 = smov [#allocation11]  }
 0xad1   :  { %639 = dma.smem_to_hbm %s918_s28, 16, %s1124_s9, [#allocation7]  }
 0xad2   :  { %902 = dma.done.wait [#allocation6], 16  }
 0xad3   :  { %903 = vsyncadd [#allocation6], 4294967280 }
 0xad4   :  { %904 = dma.done.wait [#allocation10], 16  }
 0xad5   :  { %905 = vsyncadd [#allocation10], 4294967280 }
 0xad6   :  { %906 = dma.done.wait [#allocation7], 16  }
 0xad7   :  { %907 = vsyncadd [#allocation7], 4294967280 }
 0xad8   :  { %651 = sfence }
 0xad9   :  { %652 = vsyncpa [#allocation5], 1 }
 0xada   :  { %653 = vsyncpa [#allocation6], 1 }
 0xadb   :  { %654 = vsyncpa [#allocation10], 1 }
 0xadc   :  { %655 = vsyncpa [#allocation7], 1 }

</bundles_post_ra>
